<compile_context>
chip_gen: v6e
topology: v6e:2x2x1
jax: 0.10.0
libtpu: 0.0.40
codegen_flags: <defaults>
</compile_context>

<pallas_src>
import functools

import jax
import jax.numpy as jnp
from jax.experimental import pallas as pl
from jax.experimental.pallas import tpu as pltpu


# ----------------------------------------------------------------------------
# Tank parameter ranges (stand-in for MODEL_PARAM_DICT['tank']['param_range']).
# Scaling semantics identical to the reference: low + p * (high - low).
# ----------------------------------------------------------------------------
TANK_PARAM_ORDER = ["KC", "W1", "W2", "K1", "K2", "a0", "b0", "c0", "h1", "h2",
                    "a1", "a2", "h3", "b1", "h4", "c1", "d1", "e1", "e2", "h"]
TANK_PARAM_RANGE = {
    "KC": (0.2, 1.5),  "W1": (10.0, 50.0), "W2": (10.0, 80.0),
    "K1": (0.05, 0.8), "K2": (0.05, 0.8),
    "a0": (0.01, 0.5), "b0": (0.01, 0.5), "c0": (0.01, 0.5),
    "h1": (0.0, 100.0), "h2": (0.0, 100.0),
    "a1": (0.01, 0.5), "a2": (0.01, 0.5), "h3": (0.0, 100.0),
    "b1": (0.01, 0.5), "h4": (0.0, 100.0), "c1": (0.01, 0.5),
    "d1": (0.001, 0.2), "e1": (0.001, 1.0), "e2": (0.001, 1.0),
    "h": (0.0, 100.0),
}
N_TANK_PARAMS = 20
N_STATES = 8
# Kernel parameter rows: 18 base params (e1/e2 folded away) + 6 derived constants.
N_KERNEL_PARAMS = 24
HYDRODT = 1.0
LANE = 128
SUB = 8
B_TILE = SUB * LANE          # 1024 basins per grid tile -> full (8,128) vreg per op
VMEM_SPEC = pl.BlockSpec(memory_space=pltpu.MemorySpace.VMEM)


def _round_up(x, m):
    return ((x + m - 1) // m) * m


# ----------------------------------------------------------------------------
# SimpleAnn: Linear -> ReLU -> Linear, fused with the param-limit function and
# the low/high physical-range scaling.  For param_test_way != "time_varying"
# only the LAST timestep's features are needed (the MLP is pointwise over time,
# so slicing before the MLP is mathematically identical).  The 20-wide output
# is padded to 128 lanes so the final store is unmasked lane-dense.
# ----------------------------------------------------------------------------
def _mlp_params_kernel(z_ref, w1_ref, b1_ref, w2_ref, b2_ref, lo_ref, hi_ref,
                       out_ref, *, param_func):
    hid = jnp.dot(z_ref[...], w1_ref[...], preferred_element_type=jnp.float32)
    hid = jnp.maximum(hid + b1_ref[...], 0.0)
    gen = (jnp.dot(hid, w2_ref[...], preferred_element_type=jnp.float32)
           + b2_ref[...])
    if param_func == "sigmoid":
        norm = jax.nn.sigmoid(gen)
    else:  # "clamp"
        norm = jnp.clip(gen, 0.0, 1.0)
    # Fused physical scaling: low + p * (high - low).  Padded lanes have
    # low = high = 0 -> output 0, sliced off by the wrapper.
    out_ref[...] = lo_ref[...] + norm * (hi_ref[...] - lo_ref[...])


def simple_ann_params(z2d, w1, b1, w2, b2, lows, highs, param_func):
    """z2d: (basin, n_in) -> physically-scaled tank params (basin, 20)."""
    n, _ = z2d.shape
    nout = w2.shape[1]
    n_row = _round_up(max(n, 1), SUB)
    n_lane = _round_up(nout, LANE)
    z_p = jnp.pad(z2d.astype(jnp.float32), ((0, n_row - n), (0, 0)))
    w2_p = jnp.pad(w2.astype(jnp.float32), ((0, 0), (0, n_lane - nout)))
    b2_p = jnp.pad(b2.astype(jnp.float32), (0, n_lane - nout)).reshape(1, -1)
    lo_p = jnp.pad(lows.astype(jnp.float32), (0, n_lane - nout)).reshape(1, -1)
    hi_p = jnp.pad(highs.astype(jnp.float32), (0, n_lane - nout)).reshape(1, -1)
    kernel = functools.partial(_mlp_params_kernel, param_func=param_func)
    out = pl.pallas_call(
        kernel,
        out_shape=jax.ShapeDtypeStruct((n_row, n_lane), jnp.float32),
        in_specs=[VMEM_SPEC] * 7,
        out_specs=VMEM_SPEC,
    )(z_p, w1.astype(jnp.float32), b1.astype(jnp.float32).reshape(1, -1),
      w2_p, b2_p, lo_p, hi_p)
    return out[:n, :nout]


# ----------------------------------------------------------------------------
# Tank4Dpl recursion kernel.  One grid step = one 1024-basin tile x one time
# chunk.  Basins occupy the (sublane, lane) = (8, 128) plane; time is the
# leading axis of the forcing / output blocks.
#   prcp_ref, pet_ref : (t_chunk, 8, 128)  forcing tile (clamped >= 0 in-kernel)
#   par_ref           : (24, 8, 128)       18 scaled params + 6 derived constants
#   init_ref          : (8,  8, 128)       [xf, xp, x2, xs, x3, x4, x5, qs]
#   q_ref, e_ref      : (t_chunk, 8, 128)  streamed outputs
#   state_ref         : (8,  8, 128)       VMEM scratch, carries state across
#                                          time chunks (re-init at ti == 0)
# The torch water-balance loop and routing loop are fused per timestep: the
# routing state (x5, qs) is only touched by the routing part, so the values are
# identical to running the two loops separately.
# ----------------------------------------------------------------------------
def _tank_kernel(prcp_ref, pet_ref, par_ref, init_ref, q_ref, e_ref,
                 state_ref, *, t_chunk):
    ti = pl.program_id(1)

    @pl.when(ti == 0)
    def _():
        state_ref[...] = init_ref[...]

    # Each parameter row is one full (8,128) vreg, loaded once per chunk.
    kc = par_ref[0];  w1 = par_ref[1];  w2 = par_ref[2];  k1 = par_ref[3]
    k2 = par_ref[4];  a0 = par_ref[5];  b0 = par_ref[6];  c0 = par_ref[7]
    h1 = par_ref[8];  h2 = par_ref[9];  a1 = par_ref[10]; a2 = par_ref[11]
    h3 = par_ref[12]; b1 = par_ref[13]; h4 = par_ref[14]; c1 = par_ref[15]
    d1 = par_ref[16]; hh = par_ref[17]
    # Derived routing constants, precomputed in the wrapper (no in-kernel divides).
    inv_w12 = par_ref[18]
    k1r_lo = par_ref[19]      # 1 / e1
    k1r_hi = par_ref[20]      # 1 / (e1 + e2)
    c_hi = par_ref[21]        # e2 * h / (e1 + e2)
    den_lo = par_ref[22]      # 1 / (1/e1 + dt)
    den_hi = par_ref[23]      # 1 / (1/(e1+e2) + dt)

    dt = 0.5 * (HYDRODT / 1000.0)

    def body(s, carry):
        xf, xp, x2, xs, x3, x4, x5, qs = carry
        p = jnp.maximum(prcp_ref[s], 0.0)
        e = jnp.maximum(pet_ref[s], 0.0)

        # --- soil moisture / runoff generation (torch loop #1) ---
        ep = kc * e
        et = jnp.minimum(ep, p + xp + xf)
        pe = jnp.maximum(p - et, 0.0)
        x = xf
        xf = jnp.maximum(x - jnp.maximum(ep - p, 0.0), 0.0)
        xp = jnp.maximum(xp - jnp.maximum(ep - p - x, 0.0), 0.0)
        t1 = jnp.maximum(k1 * jnp.minimum(x2, w1 - xp), 0.0)
        xp = xp + t1
        x2 = jnp.maximum(x2 - t1, 0.0)
        t2 = jnp.maximum(k2 * (xs * w1 - xp * w2) * inv_w12, 0.0)
        xp = xp + t2
        xs = jnp.maximum(xs - t2, 0.0)
        xf = xf + jnp.maximum(xp + pe - w1, 0.0)
        xp = jnp.minimum(w1, xp + pe)
        f1 = a0 * xf
        rs = jnp.where(xf > h2, (xf - h1) * a1 + (xf - h2) * a2,
                       jnp.where(xf > h1, (xf - h1) * a1, 0.0))
        x2 = x2 + f1
        xf = jnp.maximum(xf - (rs + f1), 0.0)
        f2 = b0 * x2
        ri = jnp.where(x2 > h3, (x2 - h3) * b1, 0.0)
        x2 = jnp.maximum(x2 - (f2 + ri), 0.0)
        x3 = x3 + f2
        f3 = c0 * x3
        rgs = jnp.where(x3 > h4, (x3 - h4) * c1, 0.0)
        x3 = jnp.maximum(x3 - (f3 + rgs), 0.0)
        x4 = x4 + f3
        rgd = d1 * x4
        x4 = jnp.maximum(x4 - rgd, 0.0)

        # --- channel routing (torch loop #2; predictor uses the fixed
        #     low-branch denominator, corrector reselects — matches reference) ---
        is_hi0 = x5 >= hh
        k0_r = jnp.where(is_hi0, k1r_hi, k1r_lo)
        c0_r = jnp.where(is_hi0, c_hi, 0.0)
        ii = rs + ri + rgs + rgd
        q1 = (k0_r - dt) * den_lo * qs + (ii + c0_r) * den_lo
        q1 = jnp.maximum(q1, 0.0)
        x5 = k1r_lo * q1
        is_hi1 = x5 > hh
        k1_r = jnp.where(is_hi1, k1r_hi, k1r_lo)
        c1_r = jnp.where(is_hi1, c_hi, 0.0)
        den = jnp.where(is_hi1, den_hi, den_lo)
        q1 = (k0_r - dt) * den * qs + (ii - c1_r + c0_r) * den
        q1 = jnp.maximum(q1, 0.0)
        x5 = k1_r * q1 + c1_r
        qs = q1

        # Full unmasked (8,128) vreg stores per timestep (lane- & sublane-dense).
        e_ref[s] = et
        q_ref[s] = q1
        return (xf, xp, x2, xs, x3, x4, x5, qs)

    carry0 = tuple(state_ref[i] for i in range(N_STATES))
    carry = jax.lax.fori_loop(0, t_chunk, body, carry0, unroll=8)
    state_ref[...] = jnp.stack(carry, axis=0)


def tank_run(prcp, pet, kernel_params, init_states, *, t_chunk=128):
    """Run the Tank recursion.

    prcp/pet: (T, B); kernel_params: (24, B); init_states: (8, B).
    Returns q, e of shape (T, B).
    """
    t, b = prcp.shape
    nb = max(pl.cdiv(b, B_TILE), 1)
    b_pad = nb * B_TILE
    t_chunk = min(t_chunk, _round_up(max(t, 1), SUB))
    nt = max(pl.cdiv(t, t_chunk), 1)
    t_pad = nt * t_chunk

    prcp_p = jnp.pad(prcp.astype(jnp.float32), ((0, t_pad - t), (0, b_pad - b)))
    pet_p = jnp.pad(pet.astype(jnp.float32), ((0, t_pad - t), (0, b_pad - b)))
    # Edge-pad params/init along basin so padded lanes stay finite.
    par_p = jnp.pad(kernel_params.astype(jnp.float32),
                    ((0, 0), (0, b_pad - b)), mode="edge")
    init_p = jnp.pad(init_states.astype(jnp.float32),
                     ((0, 0), (0, b_pad - b)), mode="edge")

    # Pack basins into (sublane, lane): (X, b_pad) -> (X, b_pad//128, 128);
    # each grid tile covers 8 of those rows (= 1024 basins) as a full vreg plane.
    rows = b_pad // LANE
    prcp_r = prcp_p.reshape(t_pad, rows, LANE)
    pet_r = pet_p.reshape(t_pad, rows, LANE)
    par_r = par_p.reshape(N_KERNEL_PARAMS, rows, LANE)
    init_r = init_p.reshape(N_STATES, rows, LANE)

    kernel = functools.partial(_tank_kernel, t_chunk=t_chunk)
    q_r, e_r = pl.pallas_call(
        kernel,
        out_shape=(jax.ShapeDtypeStruct((t_pad, rows, LANE), jnp.float32),  # q
                   jax.ShapeDtypeStruct((t_pad, rows, LANE), jnp.float32)), # e
        grid_spec=pltpu.PrefetchScalarGridSpec(
            num_scalar_prefetch=0,
            grid=(nb, nt),                                   # (basin tile, time)
            in_specs=[
                pl.BlockSpec((t_chunk, SUB, LANE), lambda bi, ti: (ti, bi, 0)),
                pl.BlockSpec((t_chunk, SUB, LANE), lambda bi, ti: (ti, bi, 0)),
                pl.BlockSpec((N_KERNEL_PARAMS, SUB, LANE),
                             lambda bi, ti: (0, bi, 0)),
                pl.BlockSpec((N_STATES, SUB, LANE), lambda bi, ti: (0, bi, 0)),
            ],
            out_specs=[
                pl.BlockSpec((t_chunk, SUB, LANE), lambda bi, ti: (ti, bi, 0)),
                pl.BlockSpec((t_chunk, SUB, LANE), lambda bi, ti: (ti, bi, 0)),
            ],
            scratch_shapes=[pltpu.VMEM((N_STATES, SUB, LANE), jnp.float32)],
        ),
        compiler_params=pltpu.CompilerParams(
            dimension_semantics=("parallel", "arbitrary"),
            vmem_limit_bytes=32 * 1024 * 1024),
    )(prcp_r, pet_r, par_r, init_r)

    q = q_r.reshape(t_pad, b_pad)[:t, :b]
    e = e_r.reshape(t_pad, b_pad)[:t, :b]
    return q, e


# ----------------------------------------------------------------------------
# Tank4Dpl forward (glue): derived routing constants, fused warmup.
# Running the full series once from the 0.01 initial states and discarding the
# warmup rows gives exactly the same q/e as the reference's two-pass scheme
# (the recursion is deterministic and Markov on its state).
# ----------------------------------------------------------------------------
def _derive_kernel_params(scaled_params):
    """(basin, 20) physically-scaled params -> (24, basin) kernel param rows."""
    p = scaled_params.astype(jnp.float32).T               # (20, B)
    (kc, w1, w2, k1, k2, a0, b0, c0, h1, h2,
     a1, a2, h3, b1, h4, c1, d1, e1, e2, hh) = [p[i] for i in range(N_TANK_PARAMS)]
    dt = 0.5 * (HYDRODT / 1000.0)
    k1r_lo = 1.0 / e1
    k1r_hi = 1.0 / (e1 + e2)
    return jnp.stack(
        [kc, w1, w2, k1, k2, a0, b0, c0, h1, h2,
         a1, a2, h3, b1, h4, c1, d1, hh,
         1.0 / (w1 + w2), k1r_lo, k1r_hi, e2 * hh * k1r_hi,
         1.0 / (k1r_lo + dt), 1.0 / (k1r_hi + dt)], axis=0)


def tank4dpl_forward(p_and_e, scaled_params, warmup_length):
    """p_and_e: (T, B, 2); scaled_params: (B, 20) in physical ranges."""
    n_basin = scaled_params.shape[0]
    kpar = _derive_kernel_params(scaled_params)            # (24, B)
    init = jnp.full((N_STATES, n_basin), 0.01, jnp.float32)  # xf..qs = 0.01
    prcp = p_and_e[:, :, 0].astype(jnp.float32)            # clamp >=0 is in-kernel
    pet = p_and_e[:, :, 1].astype(jnp.float32)
    q_all, e_all = tank_run(prcp, pet, kpar, init)
    return q_all[warmup_length:, :, None], e_all[warmup_length:, :, None]


# ----------------------------------------------------------------------------
# DplAnnTank: z -> ANN(+clamp/sigmoid+scale) -> params -> (+x) -> Tank -> q
# ----------------------------------------------------------------------------
class DplAnnTank:
    def __init__(self, n_input_features, n_output_features, n_hidden_states,
                 warmup_length, param_limit_func="clamp", param_test_way="final"):
        assert n_output_features == N_TANK_PARAMS
        self.warmup_length = warmup_length
        self.param_func = param_limit_func
        self.param_test_way = param_test_way
        self.lows = jnp.array([TANK_PARAM_RANGE[n][0] for n in TANK_PARAM_ORDER],
                              jnp.float32)
        self.highs = jnp.array([TANK_PARAM_RANGE[n][1] for n in TANK_PARAM_ORDER],
                               jnp.float32)
        # Deterministic synthetic weights for SimpleAnn (Linear->ReLU->Linear).
        k = jax.random.PRNGKey(42)
        k1, k2 = jax.random.split(k)
        s1 = 1.0 / jnp.sqrt(jnp.float32(n_input_features))
        s2 = 1.0 / jnp.sqrt(jnp.float32(n_hidden_states))
        self.w1 = jax.random.uniform(k1, (n_input_features, n_hidden_states),
                                     jnp.float32, -1.0, 1.0) * s1
        self.b1 = jnp.zeros((n_hidden_states,), jnp.float32)
        self.w2 = jax.random.uniform(k2, (n_hidden_states, n_output_features),
                                     jnp.float32, -1.0, 1.0) * s2
        self.b2 = jnp.full((n_output_features,), 0.5, jnp.float32)

    def __call__(self, x, z):
        if self.param_test_way == "time_varying":
            # TODO(synk): time-varying params are not consumable by Tank4Dpl's
            # forward in the reference either (it expects (basin, 20)); unsupported.
            raise NotImplementedError("time_varying params are not supported")
        if self.param_func not in ("sigmoid", "clamp"):
            raise NotImplementedError("param_limit_func must be sigmoid or clamp")
        # The MLP is pointwise over time and only the last timestep's params are
        # used ("final"), so run it only on z[-1]: (basin, n_in).  The clamp /
        # sigmoid and low/high scaling are fused into the kernel epilogue.
        scaled = simple_ann_params(z[-1], self.w1, self.b1, self.w2, self.b2,
                                   self.lows, self.highs, self.param_func)
        # TODO(synk): torch raises ValueError on NaN in the ANN output; a
        # data-dependent raise has no clean jitted/Pallas equivalent, so omitted.
        p_and_e = x[:, :, :2].astype(jnp.float32)
        q, _e = tank4dpl_forward(p_and_e, scaled, self.warmup_length)
        return q


if __name__ == "__main__":
    T, B, NIN, NH, NOUT, WARMUP = 10, 4, 16, 32, 20, 2
    key = jax.random.PRNGKey(0)
    kx, kz = jax.random.split(key)
    # x: forcing (precip, PET) in mm; z: normalized attributes for the ANN
    x = jax.random.uniform(kx, (T, B, 2), jnp.float32, 0.0, 10.0)
    z = jax.random.normal(kz, (T, B, NIN), dtype=jnp.float32)

    model = DplAnnTank(NIN, NOUT, NH, WARMUP, param_limit_func="clamp")
    q = model(x, z)
    jax.block_until_ready(q)
    assert q.shape == (T - WARMUP, B, 1) and q.dtype == jnp.float32
    assert bool(jnp.all(jnp.isfinite(q)))
    print("KERNEL_OK")
</pallas_src>

<mosaic_0001>
module attributes {stable_mosaic.version = 11 : i64} {
  func.func @_mlp_params_kernel(%arg0: memref<8x16xf32, #tpu.memory_space<vmem>>, %arg1: memref<16x32xf32, #tpu.memory_space<vmem>>, %arg2: memref<1x32xf32, #tpu.memory_space<vmem>>, %arg3: memref<32x128xf32, #tpu.memory_space<vmem>>, %arg4: memref<1x128xf32, #tpu.memory_space<vmem>>, %arg5: memref<1x128xf32, #tpu.memory_space<vmem>>, %arg6: memref<1x128xf32, #tpu.memory_space<vmem>>, %arg7: memref<8x128xf32, #tpu.memory_space<vmem>>) attributes {dimension_semantics = [], scalar_prefetch = 0 : i64, scratch_operands = 0 : i64, tpu.core_type = #tpu.core_type<tc>} {
    %c0 = arith.constant 0 : index
    %c0_0 = arith.constant 0 : index
    %0 = vector.load %arg0[%c0, %c0_0] : memref<8x16xf32, #tpu.memory_space<vmem>>, vector<8x16xf32>
    %c0_1 = arith.constant 0 : index
    %c0_2 = arith.constant 0 : index
    %1 = vector.load %arg1[%c0_1, %c0_2] : memref<16x32xf32, #tpu.memory_space<vmem>>, vector<16x32xf32>
    %cst = arith.constant dense<0.000000e+00> : vector<8x32xf32>
    %2 = tpu.matmul %0, %1, %cst {dimension_numbers = #tpu.dot_dimension_numbers<[1], [0], [0], [1], [0, 0, 1, 1], [], []>} : vector<8x16xf32>, vector<16x32xf32>, vector<8x32xf32> -> vector<8x32xf32>
    %c0_3 = arith.constant 0 : index
    %c0_4 = arith.constant 0 : index
    %3 = vector.load %arg2[%c0_3, %c0_4] : memref<1x32xf32, #tpu.memory_space<vmem>>, vector<1x32xf32>
    %4 = vector.broadcast %3 : vector<1x32xf32> to vector<8x32xf32>
    %5 = arith.addf %2, %4 : vector<8x32xf32>
    %cst_5 = arith.constant 0.000000e+00 : f32
    %6 = vector.broadcast %cst_5 : f32 to vector<8x32xf32>
    %7 = arith.maximumf %5, %6 : vector<8x32xf32>
    %c0_6 = arith.constant 0 : index
    %c0_7 = arith.constant 0 : index
    %8 = vector.load %arg3[%c0_6, %c0_7] : memref<32x128xf32, #tpu.memory_space<vmem>>, vector<32x128xf32>
    %cst_8 = arith.constant dense<0.000000e+00> : vector<8x128xf32>
    %9 = tpu.matmul %7, %8, %cst_8 {dimension_numbers = #tpu.dot_dimension_numbers<[1], [0], [0], [1], [0, 0, 1, 1], [], []>} : vector<8x32xf32>, vector<32x128xf32>, vector<8x128xf32> -> vector<8x128xf32>
    %c0_9 = arith.constant 0 : index
    %c0_10 = arith.constant 0 : index
    %10 = vector.load %arg4[%c0_9, %c0_10] : memref<1x128xf32, #tpu.memory_space<vmem>>, vector<1x128xf32>
    %11 = vector.broadcast %10 : vector<1x128xf32> to vector<8x128xf32>
    %12 = arith.addf %9, %11 : vector<8x128xf32>
    %cst_11 = arith.constant 0.000000e+00 : f32
    %cst_12 = arith.constant 1.000000e+00 : f32
    %13 = vector.broadcast %cst_11 : f32 to vector<8x128xf32>
    %14 = arith.maximumf %13, %12 : vector<8x128xf32>
    %15 = vector.broadcast %cst_12 : f32 to vector<8x128xf32>
    %16 = arith.minimumf %15, %14 : vector<8x128xf32>
    %c0_13 = arith.constant 0 : index
    %c0_14 = arith.constant 0 : index
    %17 = vector.load %arg5[%c0_13, %c0_14] : memref<1x128xf32, #tpu.memory_space<vmem>>, vector<1x128xf32>
    %c0_15 = arith.constant 0 : index
    %c0_16 = arith.constant 0 : index
    %18 = vector.load %arg6[%c0_15, %c0_16] : memref<1x128xf32, #tpu.memory_space<vmem>>, vector<1x128xf32>
    %c0_17 = arith.constant 0 : index
    %c0_18 = arith.constant 0 : index
    %19 = vector.load %arg5[%c0_17, %c0_18] : memref<1x128xf32, #tpu.memory_space<vmem>>, vector<1x128xf32>
    %20 = arith.subf %18, %19 : vector<1x128xf32>
    %21 = vector.broadcast %20 : vector<1x128xf32> to vector<8x128xf32>
    %22 = arith.mulf %16, %21 : vector<8x128xf32>
    %23 = vector.broadcast %17 : vector<1x128xf32> to vector<8x128xf32>
    %24 = arith.addf %23, %22 : vector<8x128xf32>
    %c0_19 = arith.constant 0 : index
    %c0_20 = arith.constant 0 : index
    %25 = vector.load %arg7[%c0_19, %c0_20] : memref<8x128xf32, #tpu.memory_space<vmem>>, vector<8x128xf32>
    tpu.vector_store %arg7[%c0_19, %c0_20], %24 {strides = array<i32>} : memref<8x128xf32, #tpu.memory_space<vmem>>, vector<8x128xf32>,
    return
  }
}

</mosaic_0001>

<bundles_post_ra>
// kernel: tpu_custom_call.1
= control target key start
LH: loop header
LB: loop body
LE: loop exit
PB: predicated region body
PF: predicated region fallthrough
CT: control target
= control target key end

     0   :  { %12 = vsyncpa [#allocation3], 0  ;;  %s468_s0 = inlined_call_operand.hbm [shape: f32[8,16], index: 0, kind: input, shape index: {}]   ;;  %s469_s1 = inlined_call_operand.hbm [shape: f32[16,32], index: 1, kind: input, shape index: {}]   ;;  %s470_s2 = inlined_call_operand.vmem [shape: f32[1,32], index: 2, kind: input, shape index: {}]   ;;  %s471_s3 = inlined_call_operand.hbm [shape: f32[32,128], index: 3, kind: input, shape index: {}]   ;;  %s472_s4 = inlined_call_operand.vmem [shape: f32[1,128], index: 4, kind: input, shape index: {}]   ;;  %s473_s5 = inlined_call_operand.vmem [shape: f32[1,128], index: 5, kind: input, shape index: {}]   ;;  %s474_s6 = inlined_call_operand.vmem [shape: f32[1,128], index: 6, kind: input, shape index: {}]   ;;  %s475_s7 = inlined_call_operand.hbm [shape: f32[8,128], index: 7, kind: output, shape index: {}]  }
   0x1   :  { %13 = vsyncpa [#allocation6], 0 }
   0x2   :  { %14 = vsyncpa [#allocation4], 0  ;;  %s396_s24 = smov [#allocation5]  }
   0x3   :  { %s30_s25 = sshll.u32 %s396_s24, 4  ;;  %s31_s25 = int_to_ptr.vmem [resolvable:$true] %s30_s25 }
   0x4   :  { %s318_s26 = scalar_lea.vmem %s31_s25, 256  ;;  %p323_p1 = scmp.lt.s32.totalorder %s31_s25, %s31_s25 }
   0x5   :  { %p319_p0 = scmp.ne.s32.totalorder %s31_s25, %s318_s26  ;;  %p324_p2 = scmp.lt.s32.totalorder %s318_s26, %s318_s26 }
   0x7   :  { %p325_p3 = por %p324_p2, %p323_p1 }
   0x9   :  { %p326_p4 = pnand %p325_p3, %p319_p0 }
   0xb   :  { %329 = shalt.err (!%p326_p4)
}
   0xc   :  { %s397_s27 = smov 128   ;;  %s398_s28 = smov 8  }
   0xd   :  { %36 = dma.hbm_to_vmem [thread:$0]  %s469_s1, 256, %s31_s25, [#allocation6], %s397_s27, %s397_s27, %s398_s28  }
   0xe   :  { %s399_s8 = smov [#allocation2]   ;;  %s400_s10 = smov [#allocation7]  }
   0xf   :  { %s21_s9 = sshll.u32 %s399_s8, 4  ;;  %s44_s11 = sshll.u32 %s400_s10, 4  ;;  %s22_s9 = int_to_ptr.vmem [resolvable:$true] %s21_s9  ;;  %s45_s11 = int_to_ptr.vmem [resolvable:$true] %s44_s11 }
  0x10   :  { %s338_s12 = scalar_lea.vmem %s22_s9, 128  ;;  %p343_p6 = scmp.lt.s32.totalorder %s22_s9, %s22_s9 }
  0x11   :  { %p339_p5 = scmp.ne.s32.totalorder %s22_s9, %s338_s12  ;;  %p344_p7 = scmp.lt.s32.totalorder %s338_s12, %s338_s12 }
  0x13   :  { %p345_p8 = por %p344_p7, %p343_p6 }
  0x15   :  { %p346_p9 = pnand %p345_p8, %p339_p5 }
  0x17   :  { %349 = shalt.err (!%p346_p9)
}
  0x18   :  { %24 = dma.hbm_to_vmem [thread:$0]  %s468_s0, 128, %s22_s9, [#allocation3]  }
  0x19   :  { %s358_s15 = scalar_lea.vmem %s45_s11, 512  ;;  %p363_p11 = scmp.lt.s32.totalorder %s45_s11, %s45_s11 }
  0x1a   :  { %p359_p10 = scmp.ne.s32.totalorder %s45_s11, %s358_s15  ;;  %p364_p12 = scmp.lt.s32.totalorder %s358_s15, %s358_s15 }
  0x1c   :  { %p365_p13 = por %p364_p12, %p363_p11 }
  0x1e   :  { %p366_p0 = pnand %p365_p13, %p359_p10 }
  0x20   :  { %369 = shalt.err (!%p366_p0)
}
  0x21   :  { %50 = dma.hbm_to_vmem [thread:$0]  %s471_s3, 512, %s45_s11, [#allocation6], %s397_s27, %s397_s27, %s398_s28  }
  0x22   :  { %390 = dma.done.wait [#allocation3], 128  }
  0x23   :  { %391 = vsyncadd [#allocation3], 4294967168 }
  0x24   :  { %392 = dma.done.wait [#allocation6], 768  }
  0x25   :  { %393 = vsyncadd [#allocation6], 4294966528  ;;  %v401_v0 = vmov 0.0   ;;  %vm402_vm0 = vmmov 0   ;;  %v68_v1 = vld [vmem:[#allocation5 + $0x8] sm:$0xff]  ;;  %v67_v2 = vld [vmem:[#allocation5] sm:$0xff]  ;;  %v242_v13 = vlaneseq }
  0x26   :  { %284 = vmatprep.subr.mxu0 %v401_v0  ;;  %288 = vmatprep.mubr.msk.f32.mxu0 %vm402_vm0, %v401_v0  ;;  %v66_v3 = vld [vmem:[#allocation2] sm:$0xff]  ;;  %vm76_vm1 = vcmask 130048   ;;  %v154_v4 = vld [vmem:[#allocation7 + $0x18] sm:$0xff]  ;;  %v153_v5 = vld [vmem:[#allocation7 + $0x10] sm:$0xff]  ;;  %vm162_vm2 = vcmask 261120  }
  0x27   :  { %291 = vmatprep.subr.mxu1 %v401_v0  ;;  %299 = vmatprep.mubr.msk.f32.mxu1 %vm402_vm0, %v401_v0  ;;  %v152_v6 = vld [vmem:[#allocation7 + $0x8] sm:$0xff]  ;;  %v151_v7 = vld [vmem:[#allocation7] sm:$0xff]  ;;  %v243_v14 = vshrl.u32 %v242_v13, 7 }
  0x28   :  { %285 = vmatpush3.msra.mxu0 %v68_v1  ;;  %292 = vmatpush3.msra.mxu1 %v154_v4  ;;  %v272_v8 = vld [vmem:[%s470_s2] ss:$0 sm:$0xff]  ;;  %s403_s2 = smov [#allocation8]  }
  0x29   :  { %286 = vmatprep.subr.mxu0 %v401_v0  ;;  %293 = vmatprep.subr.mxu1 %v401_v0  ;;  %v238_v15 = vld [vmem:[%s473_s5] sm:$0x1]  ;;  %v244_v19 = vsub.s32 0, %v243_v14  ;;  %s262_s23 = sshll.u32 %s403_s2, 4  ;;  %s263_s23 = int_to_ptr.vmem [resolvable:$true] %s262_s23 }
  0x2a   :  { %287 = vmatpush3.msra.mxu0 %v67_v2  ;;  %294 = vmatpush3.msra.mxu1 %v153_v5  ;;  %v239_v16 = vld [vmem:[%s474_s6] sm:$0x1]  ;;  %s370_s5 = scalar_lea.vmem %s263_s23, 128  ;;  %p375_p2 = scmp.lt.s32.totalorder %s263_s23, %s263_s23 }
  0x2b   :  { %289 = vmatmul.mubr.msk.f32.vlgmr.msra.gmra.mxu0 %vm76_vm1, %v66_v3  ;;  %295 = vmatprep.subr.mxu1 %v401_v0  ;;  %v274_v17 = vld [vmem:[%s472_s4] ss:$0 sm:$0xff]  ;;  %v240_v18 = vsub.f32 %v239_v16, %v238_v15  ;;  %v252_v26 = vrot.slane %v238_v15, %v244_v19  ;;  %p371_p1 = scmp.ne.s32.totalorder %s263_s23, %s370_s5  ;;  %p376_p3 = scmp.lt.s32.totalorder %s370_s5, %s370_s5 }
  0x2c   :  { %296 = vmatpush3.msra.mxu1 %v152_v6 }
  0x2d   :  { %297 = vmatprep.subr.mxu1 %v401_v0  ;;  %v245_v24 = vrot.slane %v240_v18, %v244_v19  ;;  %p377_p4 = por %p376_p3, %p375_p2 }
  0x2e   :  { %298 = vmatpush3.msra.mxu1 %v151_v7 }
  0x2f   :  { %p378_p5 = pnand %p377_p4, %p371_p1 }
  0xeb   :  { %v146_v9 = vpop.f32.mrf.mxu0 }
  0xec   :  { %v147_v10 = vadd.f32 %v272_v8, %v146_v9 }
  0xed   :  { %v290_v11 = vpop.f32.mrf.mxu0 }
  0xee   :  { %v150_v12 = vmax.f32 %v147_v10, 0.0 }
  0xf0   :  { %300 = vmatmul.mubr.msk.f32.vlgmr.msra.gmra.mxu1 %vm162_vm2, %v150_v12 }
 0x1b0   :  { %v232_v20 = vpop.f32.mrf.mxu1 }
 0x1b1   :  { %v233_v21 = vadd.f32 %v274_v17, %v232_v20 }
 0x1b2   :  { %v301_v22 = vpop.f32.mrf.mxu1 }
 0x1b3   :  { %v236_v23 = vmax.f32 %v233_v21, 0.0 }
 0x1b5   :  { %v237_v25 = vmin.f32 %v236_v23, 1.0 }
 0x1b7   :  { %v247_v27 = vmul.f32 %v245_v24, %v237_v25 }
 0x1b9   :  { %v254_v28 = vadd.f32 %v252_v26, %v247_v27 }
 0x1bb   :  { %255 = vst [vmem:[#allocation8] sm:$0xff] %v254_v28 }
 0x1bc   :  { %381 = shalt.err (!%p378_p5)
}
 0x1bd   :  { %265 = dma.vmem_to_hbm [thread:$0]  %s263_s23, 128, %s475_s7, [#allocation4]  }
 0x1be   :  { %394 = dma.done.wait [#allocation4], 128  }
 0x1bf   :  { %395 = vsyncadd [#allocation4], 4294967168 }
 0x1c0   :  { %269 = vsyncpa [#allocation3], 1 }
 0x1c1   :  { %270 = vsyncpa [#allocation6], 1 }
 0x1c2   :  { %271 = vsyncpa [#allocation4], 1 }

</bundles_post_ra>
